<compile_context>
chip_gen: v7x
topology: tpu7x:2x2x1
jax: 0.10.0
libtpu: 0.0.40
codegen_flags: <defaults>
</compile_context>

<pallas_src>
import functools

import jax
import jax.numpy as jnp
from jax import lax
from jax.experimental import pallas as pl
from jax.experimental.pallas import tpu as pltpu

# Hyperparameters — match the PyTorch module's __init__ defaults.
GAMMA = 0.8
TAU_INIT = 0.5
TAU_MIN = 0.05
TAU_MAX = 1.0
RHO = 0.8
ETA_INIT = 0.001
BETA_U = 0.9
GRAD_CLIP = 3.0


# --------------------------------------------------------------------------
# Kernel 1: row-blocked F.normalize(features, dim=1) -> bf16 (MXU feed).
# --------------------------------------------------------------------------
def _normalize_kernel(x_ref, o_ref):
    f = x_ref[...].astype(jnp.float32)                        # (TR, Dp)
    ss = jnp.sum(f * f, axis=1, keepdims=True)                # (TR, 1)
    # == x / max(||x||, 1e-12), rsqrt on the EUP.
    o_ref[...] = (f * lax.rsqrt(jnp.maximum(ss, 1e-24))).astype(jnp.bfloat16)


# --------------------------------------------------------------------------
# Kernel 2: per-sample-block SogCLR-DRO loss + state update.
#   Column-oriented (legal because sim and the neg mask are symmetric, so
#   column-i reductions equal the reference's row-i reductions).
# --------------------------------------------------------------------------
def _sogclr_dro_kernel(epoch_ref, fn_ref, aux_ref, tau_ref, s_ref, u_ref,
                       loss_ref, s_out_ref, u_out_ref, tau_out_ref, *, bsz, tn):
    B = bsz
    num_neg = 2 * B - 2
    inv_nn = 1.0 / num_neg

    j = pl.program_id(0)
    r1 = j * tn               # rows of the first-half samples of this block
    r2 = j * tn + B           # rows of their augmented partners
    if tn % 8 == 0 and B % 8 == 0:
        r1 = pl.multiple_of(r1, 8)
        r2 = pl.multiple_of(r2, 8)

    fa = fn_ref[...]                                          # (2B, Dp) bf16, resident
    fh1 = fn_ref[pl.ds(r1, tn), :]                            # (TN, Dp) bf16
    fh2 = fn_ref[pl.ds(r2, tn), :]                            # (TN, Dp) bf16

    # sim columns for this block: bf16 in, f32 accumulate on the MXU.
    dn = (((1,), (1,)), ((), ()))
    sim1 = lax.dot_general(fa, fh1, dn, preferred_element_type=jnp.float32)  # (2B, TN)
    sim2 = lax.dot_general(fa, fh2, dn, preferred_element_type=jnp.float32)  # (2B, TN)

    tau = tau_ref[...]                                        # (1, TN) = tau[index] block
    inv_tau = 1.0 / tau                                       # exact (tiny vector)

    # Unmasked exp / sums; the two masked-out entries per column are removed
    # below via exact corrections (actual bf16 self- and partner-dots).
    e1 = jnp.exp(sim1 * inv_tau)                              # (2B, TN)
    e2 = jnp.exp(sim2 * inv_tau)

    sum_e1 = jnp.sum(e1, axis=0, keepdims=True)               # (1, TN)
    sum_e2 = jnp.sum(e2, axis=0, keepdims=True)
    sum_es1 = jnp.sum(e1 * sim1, axis=0, keepdims=True)
    sum_es2 = jnp.sum(e2 * sim2, axis=0, keepdims=True)

    diag1 = aux_ref[0:1, :]                                   # (1, TN) bf16 self-dot, half 1
    diag2 = aux_ref[1:2, :]                                   # (1, TN) bf16 self-dot, half 2
    pos = aux_ref[2:3, :]                                     # (1, TN) positive-pair sim

    e_self1 = jnp.exp(diag1 * inv_tau)
    e_self2 = jnp.exp(diag2 * inv_tau)
    e_pos = jnp.exp(pos * inv_tau)

    g1 = (sum_e1 - e_self1 - e_pos) * inv_nn                  # (1, TN)
    g2 = (sum_e2 - e_self2 - e_pos) * inv_nn
    es1 = sum_es1 - e_self1 * diag1 - e_pos * pos             # sum(masked e * sim)
    es2 = sum_es2 - e_self2 * diag2 - e_pos * pos

    epoch = epoch_ref[0]
    s_prev = s_ref[...]                                       # (1, TN) = s[index] block
    s1 = jnp.where(epoch == 0, g1, (1.0 - GAMMA) * s_prev + GAMMA * g1)
    s2 = jnp.where(epoch == 0, g2, (1.0 - GAMMA) * s_prev + GAMMA * g2)

    inv_s1 = 1.0 / s1                                         # exact (tiny vectors)
    inv_s2 = 1.0 / s2
    ws1 = es1 * inv_s1 * inv_nn                               # == sum(w1*sim)/num_neg
    ws2 = es2 * inv_s2 * inv_nn

    # loss_1 + loss_2 per sample (wrapper does .mean() over bsz).
    loss_ref[...] = (ws1 - pos) + (ws2 - pos)

    # grad_tau reuses the loss reduction: sum(w*sim_d)/num_neg == ws * inv_tau.
    gt1 = jnp.log(s1) + RHO - ws1 * inv_tau
    gt2 = jnp.log(s2) + RHO - ws2 * inv_tau
    grad_tau = jnp.clip(0.5 * (gt1 + gt2), -GRAD_CLIP, GRAD_CLIP)

    u_new = (1.0 - BETA_U) * u_ref[...] + BETA_U * grad_tau
    tau_new = jnp.clip(tau - ETA_INIT * u_new, TAU_MIN, TAU_MAX)

    s_out_ref[...] = 0.5 * (s1 + s2)
    u_out_ref[...] = u_new
    tau_out_ref[...] = tau_new


# --------------------------------------------------------------------------
# Block-size / VMEM helpers.
# --------------------------------------------------------------------------
def _choose_col_block(B):
    if B <= 256:
        return B
    for tn in (256, 128):
        if B % tn == 0:
            return tn
    return B  # fallback: single block over the half


def _choose_row_block(n):
    if n <= 256:
        return n
    for tr in (256, 128, 64, 32, 16, 8):
        if n % tr == 0:
            return tr
    return n


def _vmem_limit_bytes(n, dp, tn):
    feat = 2 * n * dp * 2            # resident bf16 features (double-buffered)
    slabs = 12 * n * tn * 4          # live f32 (2B, TN) temporaries in the body
    rows = 2 * 16 * tn * 4           # small (1..3, TN) I/O blocks, double-buffered
    est = feat + slabs + rows
    return int(min(max(est, 32 * 1024 * 1024), 96 * 1024 * 1024))


# --------------------------------------------------------------------------
# Wrapper.
# --------------------------------------------------------------------------
def sogclr_dro_forward(features, index, state, epoch):
    """features: (2*bsz, D); index: (bsz,) int32;
    state: dict of 's'/'tau'/'u' arrays of shape (N,).
    Returns (loss_scalar, new_state)."""
    two_b, D = features.shape
    B = two_b // 2
    n = 2 * B

    # Pad feature (contraction/lane) dim to a multiple of 128 for full MXU
    # passes; zero-padding changes neither norms nor dot products.
    pad = (-D) % 128
    if pad:
        features = jnp.pad(features, ((0, 0), (0, pad)))
    Dp = D + pad

    # ---- kernel 1: normalize (row-blocked, parallel) -> bf16 ---------------
    tr = _choose_row_block(n)
    fnorm = pl.pallas_call(
        _normalize_kernel,
        out_shape=jax.ShapeDtypeStruct((n, Dp), jnp.bfloat16),
        grid=(n // tr,),
        in_specs=[pl.BlockSpec((tr, Dp), lambda i: (i, 0))],
        out_specs=pl.BlockSpec((tr, Dp), lambda i: (i, 0)),
        compiler_params=pltpu.CompilerParams(
            dimension_semantics=("parallel",)),
    )(features.astype(jnp.float32))

    # ---- per-sample aux rows (bf16 self-dots and positive-pair dots) -------
    # TODO(synk): this O(2B*D) prep and the state gather/scatter stay in XLA.
    f32n = fnorm.astype(jnp.float32)
    d = jnp.sum(f32n * f32n, axis=1)                          # (2B,) diag of bf16 sim
    p = jnp.sum(f32n[:B] * f32n[B:], axis=1)                  # (B,) positive-pair sims
    aux = jnp.stack([d[:B], d[B:], p], axis=0)                # (3, B)

    tau_g = state["tau"][index].astype(jnp.float32).reshape(1, B)
    s_g = state["s"][index].astype(jnp.float32).reshape(1, B)
    u_g = state["u"][index].astype(jnp.float32).reshape(1, B)
    epoch_arr = jnp.asarray([epoch], dtype=jnp.int32)

    # ---- kernel 2: per-sample-block loss + state update --------------------
    tn = _choose_col_block(B)
    n_blocks = B // tn
    kernel = functools.partial(_sogclr_dro_kernel, bsz=B, tn=tn)

    out_shapes = (
        jax.ShapeDtypeStruct((1, B), jnp.float32),   # loss_1 + loss_2 per sample
        jax.ShapeDtypeStruct((1, B), jnp.float32),   # new s[index]
        jax.ShapeDtypeStruct((1, B), jnp.float32),   # new u[index]
        jax.ShapeDtypeStruct((1, B), jnp.float32),   # new tau[index]
    )

    def _col_spec():
        return pl.BlockSpec((1, tn), lambda j, e: (0, j))

    grid_spec = pltpu.PrefetchScalarGridSpec(
        num_scalar_prefetch=1,
        grid=(n_blocks,),
        in_specs=[
            pl.BlockSpec((n, Dp), lambda j, e: (0, 0)),   # normalized feats, resident
            pl.BlockSpec((3, tn), lambda j, e: (0, j)),   # aux (diag1, diag2, pos)
            _col_spec(),                                  # tau[index]
            _col_spec(),                                  # s[index]
            _col_spec(),                                  # u[index]
        ],
        out_specs=(_col_spec(), _col_spec(), _col_spec(), _col_spec()),
    )

    loss_pair, s_new, u_new, tau_new = pl.pallas_call(
        kernel,
        out_shape=out_shapes,
        grid_spec=grid_spec,
        compiler_params=pltpu.CompilerParams(
            dimension_semantics=("parallel",),
            vmem_limit_bytes=_vmem_limit_bytes(n, Dp, tn)),
    )(epoch_arr, fnorm, aux, tau_g, s_g, u_g)

    # torch: (loss_1 + loss_2).mean() over the bsz rows.
    loss = jnp.sum(loss_pair) / B

    new_state = {
        "s": state["s"].at[index].set(s_new[0]),
        "u": state["u"].at[index].set(u_new[0]),
        "tau": state["tau"].at[index].set(tau_new[0]),
    }
    return loss, new_state


if __name__ == "__main__":
    bsz = 8      # small batch
    D = 32       # feature dim (padded to 128 lanes inside the wrapper)
    N = 64       # small synthetic "dataset size" for the state buffers

    key = jax.random.PRNGKey(0)
    features = jax.random.normal(key, (2 * bsz, D), dtype=jnp.float32)
    index = jnp.arange(bsz, dtype=jnp.int32)

    # Deterministic state init (matches module __init__: zeros / tau_init).
    state = {
        "s": jnp.zeros((N,), jnp.float32),
        "tau": jnp.ones((N,), jnp.float32) * TAU_INIT,
        "u": jnp.zeros((N,), jnp.float32),
    }

    # epoch 0 call (module's first forward), then epoch 1 to exercise the
    # moving-average branch and the state updates.
    loss0, state = sogclr_dro_forward(features, index, state, epoch=0)
    loss1, state = sogclr_dro_forward(features, index, state, epoch=1)

    jax.block_until_ready((loss0, loss1, state["s"], state["tau"], state["u"]))
    print("KERNEL_OK")
</pallas_src>

<mosaic_0001>
module attributes {stable_mosaic.version = 11 : i64} {
  func.func @_normalize_kernel(%arg0: i32, %arg1: memref<16x128xf32, #tpu.memory_space<vmem>>, %arg2: memref<16x128xbf16, #tpu.memory_space<vmem>>) attributes {dimension_semantics = [#tpu.dimension_semantics<parallel>], iteration_bounds = array<i64: 1>, scalar_prefetch = 0 : i64, scratch_operands = 0 : i64, tpu.core_type = #tpu.core_type<tc>, window_params = [{transform_indices = @transform_0, window_bounds = array<i64: 16, 128>}, {transform_indices = @transform_1, window_bounds = array<i64: 16, 128>}]} {
    %c0 = arith.constant 0 : index
    %c0_0 = arith.constant 0 : index
    %0 = vector.load %arg1[%c0, %c0_0] : memref<16x128xf32, #tpu.memory_space<vmem>>, vector<16x128xf32>
    %1 = arith.mulf %0, %0 : vector<16x128xf32>
    %cst = arith.constant dense<0.000000e+00> : vector<16xf32>
    %2 = vector.multi_reduction <add>, %1, %cst [1] : vector<16x128xf32> to vector<16xf32>
    %3 = vector.shape_cast %2 : vector<16xf32> to vector<16x1xf32>
    %cst_1 = arith.constant 1.000000e-24 : f32
    %4 = vector.broadcast %cst_1 : f32 to vector<16x1xf32>
    %5 = arith.maximumf %3, %4 : vector<16x1xf32>
    %6 = math.rsqrt %5 : vector<16x1xf32>
    %7 = vector.broadcast %6 : vector<16x1xf32> to vector<16x128xf32>
    %8 = arith.mulf %0, %7 : vector<16x128xf32>
    %9 = arith.truncf %8 : vector<16x128xf32> to vector<16x128xbf16>
    %c0_2 = arith.constant 0 : index
    %c0_3 = arith.constant 0 : index
    %10 = vector.load %arg2[%c0_2, %c0_3] : memref<16x128xbf16, #tpu.memory_space<vmem>>, vector<16x128xbf16>
    tpu.vector_store %arg2[%c0_2, %c0_3], %9 {strides = array<i32>} : memref<16x128xbf16, #tpu.memory_space<vmem>>, vector<16x128xbf16>,
    return
  }
  func.func @transform_0(%arg0: i32) -> (i32, i32) {
    %c0_i32 = arith.constant 0 : i32
    %c0_i32_0 = arith.constant 0 : i32
    return %arg0, %c0_i32 : i32, i32
  }
  func.func @transform_1(%arg0: i32) -> (i32, i32) {
    %c0_i32 = arith.constant 0 : i32
    %c0_i32_0 = arith.constant 0 : i32
    return %arg0, %c0_i32 : i32, i32
  }
}

</mosaic_0001>

<bundles_post_ra>
// kernel: tpu_custom_call.1
= control target key start
LH: loop header
LB: loop body
LE: loop exit
PB: predicated region body
PF: predicated region fallthrough
CT: control target
= control target key end

     0   :  { %6 = vsyncpa [#allocation3], 0  ;;  %s171_s0 = inlined_call_operand.hbm [shape: f32[16,128], index: 0, kind: input, shape index: {}]   ;;  %s172_s1 = inlined_call_operand.hbm [shape: bf16[16,128], index: 1, kind: output, shape index: {}]  }
   0x1   :  { %7 = vsyncpa [#allocation4], 0  ;;  %s131_s6 = smov [#allocation2]   ;;  %s83_s10 = scalar_lea.hbm %s171_s0, 256 }
   0x2   :  { %s13_s7 = sshll.u32 %s131_s6, 4  ;;  %p84_p0 = scmp.ne.s32.totalorder %s171_s0, %s83_s10  ;;  %s14_s7 = int_to_ptr.vmem [resolvable:$true] %s13_s7 }
   0x3   :  { %p87_p1 = scmp.lt.u32.totalorder %s83_s10, %s171_s0 }
   0x5   :  { %p89_p2 = pnand %p87_p1, %p84_p0 }
   0x7   :  { %92 = shalt.err (!%p89_p2)
}
   0x8   :  { %s93_s15 = scalar_lea.vmem %s14_s7, 256  ;;  %p98_p4 = scmp.lt.s32.totalorder %s14_s7, %s14_s7 }
   0x9   :  { %p94_p3 = scmp.ne.s32.totalorder %s14_s7, %s93_s15  ;;  %p99_p5 = scmp.lt.s32.totalorder %s93_s15, %s93_s15 }
   0xb   :  { %p100_p6 = por %p99_p5, %p98_p4 }
   0xd   :  { %p101_p7 = pnand %p100_p6, %p94_p3 }
   0xf   :  { %104 = shalt.err (!%p101_p7)
}
  0x10   :  { %s132_s16 = smov 128   ;;  %s133_s17 = smov 8  }
  0x11   :  { %19 = dma.hbm_to_vmem [thread:$0]  %s171_s0, 256, %s14_s7, [#allocation3], %s132_s16, %s132_s16, %s133_s17  }
  0x12   :  { %127 = dma.done.wait [#allocation3], 256  }
  0x13   :  { %128 = vsyncadd [#allocation3], 4294967040  ;;  %v23_v0 = vld [vmem:[#allocation2] sm:$0xff]  ;;  %v24_v1 = vld [vmem:[#allocation2 + $0x8] sm:$0xff]  ;;  %s134_s20 = smov [#allocation5]  }
  0x14   :  { %v25_v2 = vmul.f32 %v23_v0, %v23_v0  ;;  %v26_v3 = vmul.f32 %v24_v1, %v24_v1  ;;  %s52_s21 = sshll.u32 %s134_s20, 4  ;;  %s53_s21 = int_to_ptr.vmem [resolvable:$true] %s52_s21 }
  0x15   :  { %s105_s0 = scalar_lea.vmem %s53_s21, 128  ;;  %p110_p9 = scmp.lt.s32.totalorder %s53_s21, %s53_s21 }
  0x16   :  { %27 = vadd.xlane.f32.xlu0 %v25_v2  ;;  %p106_p8 = scmp.ne.s32.totalorder %s53_s21, %s105_s0  ;;  %p111_p10 = scmp.lt.s32.totalorder %s105_s0, %s105_s0 }
  0x18   :  { %p112_p11 = por %p111_p10, %p110_p9 }
  0x1a   :  { %29 = vadd.xlane.f32.xlu0 %v26_v3  ;;  %p113_p12 = pnand %p112_p11, %p106_p8 }
  0xa3   :  { %v28_v4 = vpop.xlane.xlu0 %27 }
  0xa4   :  { %v31_v5 = vmax.f32 %v28_v4, 1e-24 }
  0xa6   :  { %79 = vrsqrt.f32 %v31_v5 }
  0xa7   :  { %v30_v6 = vpop.xlane.xlu0 %29 }
  0xa8   :  { %v32_v7 = vmax.f32 %v30_v6, 1e-24 }
  0xaa   :  { %81 = vrsqrt.f32 %v32_v7 }
  0xb0   :  { %v80_v8 = vpop.eup %79 }
  0xb1   :  { %v35_v10 = vmul.f32 %v80_v8, %v23_v0 }
  0xb4   :  { %v82_v9 = vpop.eup %81 }
  0xb5   :  { %v36_v11 = vmul.f32 %v82_v9, %v24_v1 }
  0xb7   :  { %v71_v12 = vpack.c.bf16 %v36_v11, %v35_v10 }
  0xb9   :  { %72 = vst [vmem:[#allocation5] sm:$0xff] %v71_v12  }
  0xba   :  { %116 = shalt.err (!%p113_p12)
}
  0xbb   :  { %s117_s24 = scalar_lea.hbm %s172_s1, 128 }
  0xbc   :  { %p118_p13 = scmp.ne.s32.totalorder %s172_s1, %s117_s24  ;;  %p121_p0 = scmp.lt.u32.totalorder %s117_s24, %s172_s1 }
  0xbe   :  { %p123_p1 = pnand %p121_p0, %p118_p13 }
  0xc0   :  { %126 = shalt.err (!%p123_p1)
}
  0xc1   :  { %s135_s29 = smov 64   ;;  %s136_s30 = smov 4  }
  0xc2   :  { %58 = dma.vmem_to_hbm [thread:$0]  %s53_s21, 128, %s172_s1, [#allocation4], %s135_s29, %s135_s29, %s136_s30  }
  0xc3   :  { %129 = dma.done.wait [#allocation4], 128  }
  0xc4   :  { %130 = vsyncadd [#allocation4], 4294967168 }
  0xc5   :  { %62 = vsyncpa [#allocation3], 1 }
  0xc6   :  { %63 = vsyncpa [#allocation4], 1 }

</bundles_post_ra>
